<compile_context>
chip_gen: v7x
topology: tpu7x:2x2x1
jax: 0.10.0
libtpu: 0.0.40
codegen_flags: <defaults>
</compile_context>

<pallas_src>
import functools
import math

import jax
import jax.numpy as jnp
from jax.experimental import pallas as pl
from jax.experimental.pallas import tpu as pltpu


def _round_up(v, m):
    return ((v + m - 1) // m) * m


def _vmem_capacity_bytes():
    try:
        return int(pltpu.get_tpu_info().vmem_capacity_bytes)
    except Exception:
        return 64 << 20  # conservative (v7x per-TC VMEM)


def _mlp_kernel(x_ref, w1_ref, b1_ref, w2_ref, b2_ref, o_ref):
    """One row-tile of: leaky_relu(x @ W1_eff + b1_eff) @ W2_eff + b2_eff.

    All EqualLinear scales (s1, s2, lr_mul) and the fused_lrelu sqrt(2) are already
    folded into W*_eff / b*_eff by the wrapper, so the kernel is two bf16 MXU
    matmuls with f32 accumulation plus a leaky-relu.
    """
    x = x_ref[...].astype(jnp.bfloat16)                         # (TM, in_p)
    h = jnp.dot(x, w1_ref[...], preferred_element_type=jnp.float32)
    h = h + b1_ref[...]                                          # (1, mid_p) broadcast
    h = jnp.maximum(h, 0.2 * h)                                  # leaky_relu(0.2); sqrt(2) in W2_eff
    y = jnp.dot(h.astype(jnp.bfloat16), w2_ref[...],
                preferred_element_type=jnp.float32)
    y = y + b2_ref[...]                                          # (1, out_p) broadcast
    o_ref[...] = y.astype(o_ref.dtype)


@functools.partial(jax.jit, static_argnames=("lr_mul",))
def mlp_pallas(x, w1_t, b1, w2_t, b2, *, lr_mul=0.01):
    """x: (B, N, in) or (M, in). w*_t: (in_dim, out_dim). b*: (out_dim,)."""
    orig_shape = x.shape
    x2d = x.reshape(-1, orig_shape[-1]) if x.ndim == 3 else x
    M, in_size = x2d.shape
    mid_size = w1_t.shape[1]
    out_size = w2_t.shape[1]

    # EqualLinear equal-lr scales (Python constants).
    s1 = (1.0 / math.sqrt(in_size)) * lr_mul
    s2 = (1.0 / math.sqrt(mid_size)) * lr_mul

    # Lane-dense padding targets for feature dims.
    in_p = _round_up(in_size, 128)
    mid_p = _round_up(mid_size, 128)
    out_p = _round_up(out_size, 128)

    # Fold scales (and the fused_lrelu sqrt(2)) into weights/biases; cast weights to
    # bf16 (O(1) values after the fold, so bf16 is numerically safe).
    w1_eff = (w1_t * jnp.float32(s1)).astype(jnp.bfloat16)
    w2_eff = (w2_t * jnp.float32(s2 * math.sqrt(2.0))).astype(jnp.bfloat16)
    b1_eff = (b1 * jnp.float32(lr_mul)).astype(jnp.float32).reshape(1, mid_size)
    b2_eff = (b2 * jnp.float32(lr_mul)).astype(jnp.float32).reshape(1, out_size)

    # Feature-dim padding only when needed (weights/biases are small one-time pads;
    # x is padded only if in_size itself is unaligned). M is never padded: the last
    # row tile is a partial block and its out-of-bounds stores are masked.
    x_in = x2d
    if in_p != in_size:
        x_in = jnp.pad(x_in, ((0, 0), (0, in_p - in_size)))
        w1_eff = jnp.pad(w1_eff, ((0, in_p - in_size), (0, 0)))
    if mid_p != mid_size:
        w1_eff = jnp.pad(w1_eff, ((0, 0), (0, mid_p - mid_size)))
        w2_eff = jnp.pad(w2_eff, ((0, mid_p - mid_size), (0, 0)))
        b1_eff = jnp.pad(b1_eff, ((0, 0), (0, mid_p - mid_size)))
    if out_p != out_size:
        w2_eff = jnp.pad(w2_eff, ((0, 0), (0, out_p - out_size)))
        b2_eff = jnp.pad(b2_eff, ((0, 0), (0, out_p - out_size)))

    # --- row tile: multiple of 8, at least two tiles for moderate M (so the
    # "parallel" axis can use both v7x TensorCores), capped at 512 ---
    if M <= 8:
        TM = 8
    else:
        TM = min(512, _round_up(pl.cdiv(M, 2), 8))

    # VMEM budget (generation-aware). Weights/biases are single-buffered (whole-array
    # VMEM operands); x/y row tiles are double-buffered by the pipeline.
    w_bytes = in_p * mid_p * 2 + mid_p * out_p * 2 + (mid_p + out_p) * 4

    def _need(tm):
        return (w_bytes
                + 2 * tm * in_p * 4          # x double buffer (f32 in HBM/VMEM)
                + 2 * tm * out_p * 4         # y double buffer (f32)
                + tm * mid_p * 4             # h (f32)
                + tm * mid_p * 2             # h bf16 copy
                + tm * in_p * 2)             # x bf16 copy

    cap = int(0.72 * _vmem_capacity_bytes())
    while _need(TM) + (4 << 20) > cap and TM > 64:
        TM = max(64, _round_up(TM // 2, 8))
    grid_m = pl.cdiv(M, TM)

    vmem_bytes = int(min(max(_need(TM) + (4 << 20), 8 << 20), cap))

    out_arr = pl.pallas_call(
        _mlp_kernel,
        out_shape=jax.ShapeDtypeStruct((M, out_p), jnp.float32),
        grid=(grid_m,),
        in_specs=[
            pl.BlockSpec((TM, in_p), lambda i: (i, 0)),                 # x row-tile (pipelined)
            pl.BlockSpec(memory_space=pltpu.MemorySpace.VMEM),          # W1_eff resident
            pl.BlockSpec(memory_space=pltpu.MemorySpace.VMEM),          # b1_eff resident
            pl.BlockSpec(memory_space=pltpu.MemorySpace.VMEM),          # W2_eff resident
            pl.BlockSpec(memory_space=pltpu.MemorySpace.VMEM),          # b2_eff resident
        ],
        out_specs=pl.BlockSpec((TM, out_p), lambda i: (i, 0)),
        compiler_params=pltpu.CompilerParams(
            dimension_semantics=("parallel",),
            vmem_limit_bytes=vmem_bytes,
        ),
    )(x_in, w1_eff, b1_eff, w2_eff, b2_eff)

    out2d = out_arr if out_p == out_size else out_arr[:, :out_size]
    if x.ndim == 3:
        return out2d.reshape(orig_shape[0], orig_shape[1], out_size)
    return out2d


def mlp_reference(x, w1_t, b1, w2_t, b2, *, lr_mul=0.01):
    """Pure-JAX f32 reference of the PyTorch MLP forward."""
    shape = x.shape
    x2d = x.reshape(-1, shape[-1]) if x.ndim == 3 else x
    in_size = x2d.shape[-1]
    mid_size = w1_t.shape[1]
    s1 = (1.0 / math.sqrt(in_size)) * lr_mul
    s2 = (1.0 / math.sqrt(mid_size)) * lr_mul
    h = x2d @ (w1_t * s1) + b1 * lr_mul
    h = jnp.where(h >= 0, h, 0.2 * h) * math.sqrt(2.0)
    y = h @ (w2_t * s2) + b2 * lr_mul
    return y.reshape(shape[0], shape[1], -1) if x.ndim == 3 else y


if __name__ == "__main__":
    # Small shapes consistent with the module's forward: (batch, seq, in_size).
    B, N = 2, 8
    in_size, mid_size, out_size = 32, 64, 32
    lr_mul = 0.01

    key = jax.random.PRNGKey(0)
    kx, kw1, kw2, _ = jax.random.split(key, 4)

    x = jax.random.normal(kx, (B, N, in_size), dtype=jnp.float32)

    # EqualLinear param init: weight = randn(out, in) / lr_mul ; bias zeros (bias_init=0).
    w1 = jax.random.normal(kw1, (mid_size, in_size), dtype=jnp.float32) / lr_mul
    b1 = jnp.zeros((mid_size,), dtype=jnp.float32)
    w2 = jax.random.normal(kw2, (out_size, mid_size), dtype=jnp.float32) / lr_mul
    b2 = jnp.zeros((out_size,), dtype=jnp.float32)

    # Pass weights transposed as (in, out) so the kernel computes x @ W.
    w1_t = w1.T
    w2_t = w2.T

    out = mlp_pallas(x, w1_t, b1, w2_t, b2, lr_mul=lr_mul)
    out = jax.block_until_ready(out)

    ref = mlp_reference(x, w1_t, b1, w2_t, b2, lr_mul=lr_mul)
    assert out.shape == (B, N, out_size), out.shape
    # bf16 matmul operands (scales folded) -> loosened tolerance vs. f32 reference.
    max_err = float(jnp.max(jnp.abs(out - ref)))
    assert jnp.allclose(out, ref, atol=5e-2, rtol=5e-2), max_err

    print("KERNEL_OK")
</pallas_src>

<mosaic_0001>
module attributes {stable_mosaic.version = 11 : i64} {
  func.func @_mlp_kernel(%arg0: i32, %arg1: memref<8x128xf32, #tpu.memory_space<vmem>>, %arg2: memref<128x128xbf16, #tpu.memory_space<vmem>>, %arg3: memref<1x128xf32, #tpu.memory_space<vmem>>, %arg4: memref<128x128xbf16, #tpu.memory_space<vmem>>, %arg5: memref<1x128xf32, #tpu.memory_space<vmem>>, %arg6: memref<8x128xf32, #tpu.memory_space<vmem>>) attributes {dimension_semantics = [#tpu.dimension_semantics<parallel>], iteration_bounds = array<i64: 2>, scalar_prefetch = 0 : i64, scratch_operands = 0 : i64, tpu.core_type = #tpu.core_type<tc>, window_params = [{transform_indices = @transform_0, window_bounds = array<i64: 8, 128>}, {pipeline_mode = #tpu.pipeline_mode<synchronous>, transform_indices = @transform_1, window_bounds = array<i64: 128, 128>}, {pipeline_mode = #tpu.pipeline_mode<synchronous>, transform_indices = @transform_2, window_bounds = array<i64: 1, 128>}, {pipeline_mode = #tpu.pipeline_mode<synchronous>, transform_indices = @transform_3, window_bounds = array<i64: 128, 128>}, {pipeline_mode = #tpu.pipeline_mode<synchronous>, transform_indices = @transform_4, window_bounds = array<i64: 1, 128>}, {transform_indices = @transform_5, window_bounds = array<i64: 8, 128>}]} {
    %c0 = arith.constant 0 : index
    %c0_0 = arith.constant 0 : index
    %0 = vector.load %arg1[%c0, %c0_0] : memref<8x128xf32, #tpu.memory_space<vmem>>, vector<8x128xf32>
    %1 = arith.truncf %0 : vector<8x128xf32> to vector<8x128xbf16>
    %c0_1 = arith.constant 0 : index
    %c0_2 = arith.constant 0 : index
    %2 = vector.load %arg2[%c0_1, %c0_2] : memref<128x128xbf16, #tpu.memory_space<vmem>>, vector<128x128xbf16>
    %cst = arith.constant dense<0.000000e+00> : vector<8x128xf32>
    %3 = tpu.matmul %1, %2, %cst {dimension_numbers = #tpu.dot_dimension_numbers<[1], [0], [0], [1], [0, 0, 1, 1], [], []>} : vector<8x128xbf16>, vector<128x128xbf16>, vector<8x128xf32> -> vector<8x128xf32>
    %c0_3 = arith.constant 0 : index
    %c0_4 = arith.constant 0 : index
    %4 = vector.load %arg3[%c0_3, %c0_4] : memref<1x128xf32, #tpu.memory_space<vmem>>, vector<1x128xf32>
    %5 = vector.broadcast %4 : vector<1x128xf32> to vector<8x128xf32>
    %6 = arith.addf %3, %5 : vector<8x128xf32>
    %cst_5 = arith.constant 2.000000e-01 : f32
    %7 = vector.broadcast %cst_5 : f32 to vector<8x128xf32>
    %8 = arith.mulf %7, %6 : vector<8x128xf32>
    %9 = arith.maximumf %6, %8 : vector<8x128xf32>
    %10 = arith.truncf %9 : vector<8x128xf32> to vector<8x128xbf16>
    %c0_6 = arith.constant 0 : index
    %c0_7 = arith.constant 0 : index
    %11 = vector.load %arg4[%c0_6, %c0_7] : memref<128x128xbf16, #tpu.memory_space<vmem>>, vector<128x128xbf16>
    %cst_8 = arith.constant dense<0.000000e+00> : vector<8x128xf32>
    %12 = tpu.matmul %10, %11, %cst_8 {dimension_numbers = #tpu.dot_dimension_numbers<[1], [0], [0], [1], [0, 0, 1, 1], [], []>} : vector<8x128xbf16>, vector<128x128xbf16>, vector<8x128xf32> -> vector<8x128xf32>
    %c0_9 = arith.constant 0 : index
    %c0_10 = arith.constant 0 : index
    %13 = vector.load %arg5[%c0_9, %c0_10] : memref<1x128xf32, #tpu.memory_space<vmem>>, vector<1x128xf32>
    %14 = vector.broadcast %13 : vector<1x128xf32> to vector<8x128xf32>
    %15 = arith.addf %12, %14 : vector<8x128xf32>
    %c0_11 = arith.constant 0 : index
    %c0_12 = arith.constant 0 : index
    %16 = vector.load %arg6[%c0_11, %c0_12] : memref<8x128xf32, #tpu.memory_space<vmem>>, vector<8x128xf32>
    tpu.vector_store %arg6[%c0_11, %c0_12], %15 {strides = array<i32>} : memref<8x128xf32, #tpu.memory_space<vmem>>, vector<8x128xf32>,
    return
  }
  func.func @transform_0(%arg0: i32) -> (i32, i32) {
    %c0_i32 = arith.constant 0 : i32
    %c0_i32_0 = arith.constant 0 : i32
    return %arg0, %c0_i32 : i32, i32
  }
  func.func @transform_1(%arg0: i32) -> (i32, i32) {
    %c0_i32 = arith.constant 0 : i32
    %c0_i32_0 = arith.constant 0 : i32
    %c0_i32_1 = arith.constant 0 : i32
    return %c0_i32, %c0_i32_0 : i32, i32
  }
  func.func @transform_2(%arg0: i32) -> (i32, i32) {
    %c0_i32 = arith.constant 0 : i32
    %c0_i32_0 = arith.constant 0 : i32
    %c0_i32_1 = arith.constant 0 : i32
    return %c0_i32, %c0_i32_0 : i32, i32
  }
  func.func @transform_3(%arg0: i32) -> (i32, i32) {
    %c0_i32 = arith.constant 0 : i32
    %c0_i32_0 = arith.constant 0 : i32
    %c0_i32_1 = arith.constant 0 : i32
    return %c0_i32, %c0_i32_0 : i32, i32
  }
  func.func @transform_4(%arg0: i32) -> (i32, i32) {
    %c0_i32 = arith.constant 0 : i32
    %c0_i32_0 = arith.constant 0 : i32
    %c0_i32_1 = arith.constant 0 : i32
    return %c0_i32, %c0_i32_0 : i32, i32
  }
  func.func @transform_5(%arg0: i32) -> (i32, i32) {
    %c0_i32 = arith.constant 0 : i32
    %c0_i32_0 = arith.constant 0 : i32
    return %arg0, %c0_i32 : i32, i32
  }
}

</mosaic_0001>

<bundles_post_ra>
// kernel: mlp_pallas.1
= control target key start
LH: loop header
LB: loop body
LE: loop exit
PB: predicated region body
PF: predicated region fallthrough
CT: control target
= control target key end

     0   :  { %s653_s18 = smov 0   ;;  %s735_s0 = inlined_call_operand.vmem [shape: f32[16,128], index: 0, kind: input, shape index: {}]   ;;  %s736_s1 = inlined_call_operand.vmem [shape: bf16[128,128], index: 1, kind: input, shape index: {}]   ;;  %s737_s2 = inlined_call_operand.vmem [shape: f32[1,128], index: 2, kind: input, shape index: {}]   ;;  %s738_s3 = inlined_call_operand.vmem [shape: bf16[128,128], index: 3, kind: input, shape index: {}]   ;;  %s739_s4 = inlined_call_operand.vmem [shape: f32[1,128], index: 4, kind: input, shape index: {}]   ;;  %s740_s5 = inlined_call_operand.vmem [shape: f32[16,128], index: 5, kind: output, shape index: {}]  }
   0x1 LB: > { %s502_s19 = sadd.s32 4294967295, %s619_s18   ;;  %p506_p0 = scmp.ge.s32.totalorder %s619_s18, 1  ;;  %s619_s18 = sphi %s653_s18, %s15_s18  }
   0x2   : > { %p186_p1 = scmp.lt.s32.totalorder %s619_s18, 3 }
   0x4   : > { %p187_p2 = pnand %p506_p0, %p186_p1 }
   0x5   : > { %v597_v0 = vld [vmem:[%s736_s1] sm:$0xff] (!%p187_p2)   ;;  %v621_v1 = vmov (!%p187_p2), 0.0   ;;  %v598_v2 = vld [vmem:[%s736_s1 + $0x8] sm:$0xff] (!%p187_p2)   ;;  %vm622_vm0 = vmmov (!%p187_p2), 0   ;;  %v599_v3 = vld [vmem:[%s736_s1 + $0x10] sm:$0xff] (!%p187_p2)   ;;  %p212_p3 = scmp.lt.s32.totalorder (!%p187_p2), %s502_s19, 1 }
   0x6   : > { %190 = sbr.rel (%p187_p2) target bundleno = 473 (0x1d9), region = 40  ;;  %547 = vmatprep.subr.bf16.mxu0 (!%p187_p2), %v621_v1  ;;  %567 = vmatprep.subr.bf16.mxu1 (!%p187_p2), %v621_v1  ;;  %v605_v4 = vld [vmem:[%s738_s3] sm:$0xff] (!%p187_p2)   ;;  %v600_v5 = vld [vmem:[%s736_s1 + $0x18] sm:$0xff] (!%p187_p2)   ;;  %v606_v6 = vld [vmem:[%s738_s3 + $0x8] sm:$0xff] (!%p187_p2)  }
   0x7   : > { %548 = vmatpush3.bf16.msra.mxu0 (!%p187_p2), %v597_v0  ;;  %563 = vmatprep.mubr.msk.bf16.mxu0 (!%p187_p2), %vm622_vm0, %v621_v1  ;;  %v601_v7 = vld [vmem:[%s736_s1 + $0x20] sm:$0xff] (!%p187_p2)   ;;  %v607_v8 = vld [vmem:[%s738_s3 + $0x10] sm:$0xff] (!%p187_p2)   ;;  %v602_v9 = vld [vmem:[%s736_s1 + $0x28] sm:$0xff] (!%p187_p2)  }
   0x8   : > { %549 = vmatprep.subr.bf16.mxu0 (!%p187_p2), %v621_v1  ;;  %583 = vmatprep.mubr.msk.bf16.mxu1 (!%p187_p2), %vm622_vm0, %v621_v1  ;;  %v608_v10 = vld [vmem:[%s738_s3 + $0x18] sm:$0xff] (!%p187_p2)   ;;  %v603_v11 = vld [vmem:[%s736_s1 + $0x30] sm:$0xff] (!%p187_p2)   ;;  %v609_v12 = vld [vmem:[%s738_s3 + $0x20] sm:$0xff] (!%p187_p2)  }
   0x9   : > { %568 = vmatpush3.bf16.msra.mxu1 (!%p187_p2), %v605_v4  ;;  %v604_v13 = vld [vmem:[%s736_s1 + $0x38] sm:$0xff] (!%p187_p2)   ;;  %v610_v15 = vld [vmem:[%s738_s3 + $0x28] sm:$0xff] (!%p187_p2)   ;;  %v611_v17 = vld [vmem:[%s738_s3 + $0x30] sm:$0xff] (!%p187_p2)  }
   0xa   : > { %569 = vmatprep.subr.bf16.mxu1 (!%p187_p2), %v621_v1  ;;  %v612_v18 = vld [vmem:[%s738_s3 + $0x38] sm:$0xff] (!%p187_p2)   ;;  %v509_v19 = vld [vmem:[%s737_s2] ss:$0 sm:$0xff] (!%p187_p2) }
   0xb   : > { %550 = vmatpush3.bf16.msra.mxu0 (!%p187_p2), %v598_v2  ;;  %v518_v28 = vld [vmem:[%s739_s4] ss:$0 sm:$0xff] (!%p187_p2) }
   0xc   : > { %551 = vmatprep.subr.bf16.mxu0 (!%p187_p2), %v621_v1 }
   0xd   : > { %570 = vmatpush3.bf16.msra.mxu1 %v606_v6  ;;  %s742_s19 = smov (!%p212_p3, %s502_s19), 1 }
   0xe   : > { %571 = vmatprep.subr.bf16.mxu1 %v621_v1  ;;  %s507_s15 = sshll.u32 %s742_s19, 3 }
   0xf   : > { %552 = vmatpush3.bf16.msra.mxu0 %v599_v3  ;;  %s215_s22 = scalar_lea.vmem %s735_s0, %s507_s15  ;;  %s219_s14 = scalar_lea.vmem %s740_s5, %s507_s15 }
  0x10   : > { %553 = vmatprep.subr.bf16.mxu0 %v621_v1  ;;  %v221_v14 = vld [vmem:[%s215_s22] sm:$0xff] }
  0x11   : > { %572 = vmatpush3.bf16.msra.mxu1 %v607_v8  ;;  %v222_v16 = vpack.c.bf16 %v221_v14, %v221_v14 }
  0x12   : > { %573 = vmatprep.subr.bf16.mxu1 %v621_v1 }
  0x13   : > { %554 = vmatpush3.bf16.msra.mxu0 %v600_v5 }
  0x14   : > { %555 = vmatprep.subr.bf16.mxu0 %v621_v1 }
  0x15   : > { %574 = vmatpush3.bf16.msra.mxu1 %v608_v10 }
  0x16   : > { %575 = vmatprep.subr.bf16.mxu1 %v621_v1 }
  0x17   : > { %556 = vmatpush3.bf16.msra.mxu0 %v601_v7 }
  0x18   : > { %557 = vmatprep.subr.bf16.mxu0 %v621_v1 }
  0x19   : > { %576 = vmatpush3.bf16.msra.mxu1 %v609_v12 }
  0x1a   : > { %577 = vmatprep.subr.bf16.mxu1 %v621_v1 }
  0x1b   : > { %558 = vmatpush3.bf16.msra.mxu0 %v602_v9 }
  0x1c   : > { %559 = vmatprep.subr.bf16.mxu0 %v621_v1 }
  0x1d   : > { %578 = vmatpush3.bf16.msra.mxu1 %v610_v15 }
  0x1e   : > { %579 = vmatprep.subr.bf16.mxu1 %v621_v1 }
  0x1f   : > { %560 = vmatpush3.bf16.msra.mxu0 %v603_v11 }
  0x20   : > { %561 = vmatprep.subr.bf16.mxu0 %v621_v1 }
  0x21   : > { %580 = vmatpush3.bf16.msra.mxu1 %v611_v17 }
  0x22   : > { %581 = vmatprep.subr.bf16.mxu1 %v621_v1 }
  0x23   : > { %562 = vmatpush3.bf16.msra.mxu0 %v604_v13 }
  0x25   : > { %582 = vmatpush3.bf16.msra.mxu1 %v612_v18 }
  0x26   : > { %564 = vmatmul.mubr.bf16.vlgmr.msra.gmra.mrb[0].mxu0 %v222_v16 }
  0xf9   : > { %v328_v20 = vpop.f32.mrb[0].mxu0 }
  0xfa   : > { %v329_v21 = vadd.f32 %v509_v19, %v328_v20  ;;  %v565_v22 = vpop.f32.mrb[1].mxu0 }
  0xfb   : > { %v331_v23 = vpop.f32.mrb[2].mxu0 }
  0xfc   : > { %v334_v24 = vmul.f32 0.2, %v329_v21  ;;  %v566_v25 = vpop.f32.mrb[3].mxu0 }
  0xfe   : > { %v335_v26 = vmax.f32 %v329_v21, %v334_v24 }
 0x100   : > { %v336_v27 = vpack.c.bf16 %v335_v26, %v335_v26 }
 0x102   : > { %584 = vmatmul.mubr.bf16.vlgmr.msra.gmra.mrb[0].mxu1 %v336_v27 }
 0x1d5   : > { %v442_v29 = vpop.f32.mrb[0].mxu1 }
 0x1d6   : > { %v443_v30 = vadd.f32 %v518_v28, %v442_v29  ;;  %v585_v31 = vpop.f32.mrb[1].mxu1 }
 0x1d7   : > { %v445_v32 = vpop.f32.mrb[2].mxu1 }
 0x1d8   : > { %448 = vst [vmem:[%s219_s14] sm:$0xff] %v443_v30  ;;  %v586_v33 = vpop.f32.mrb[3].mxu1 }
 0x1d9 PF: > { %s15_s18 = sadd.s32 1, %s619_s18  }
 0x1da   : > { %p12_p4 = scmp.ge.s32.totalorder %s15_s18, 4  }
 0x1dc   :  { %14 = sbr.rel (!%p12_p4) target bundleno = 1 (0x1), region = 70 }

</bundles_post_ra>
